<compile_context>
chip_gen: v7x
topology: tpu7x:2x2x1
jax: 0.10.0
libtpu: 0.0.40
codegen_flags: <defaults>
</compile_context>

<pallas_src>
import functools
import math

import jax
import jax.numpy as jnp
from jax.experimental import pallas as pl
from jax.experimental.pallas import tpu as pltpu


# ----------------------------- tiling helpers ------------------------------ #

_TM_DENSE = 512   # row tile for dense layers (keeps VMEM < ~20 MB at BERT-base)
_TQ_ATTN = 256    # query tile for attention
_VMEM_LIMIT = 32 * 1024 * 1024  # explicit scoped-VMEM limit (v5e default is 16 MiB)


def _pick_row_tile(dim, target):
    """Largest row tile <= target that divides `dim` and is a multiple of 8.

    Falls back to the full dim only when dim <= target (block == full extent,
    always legal) or when no 8-granular divisor exists.
    """
    if dim <= target:
        return dim
    t = (target // 8) * 8
    for cand in range(t, 0, -8):
        if dim % cand == 0:
            return cand
    return dim  # TODO(synk): masked edge tiles for pathological row counts.


def _mosaic_params(*semantics):
    return pltpu.CompilerParams(dimension_semantics=semantics,
                                vmem_limit_bytes=_VMEM_LIMIT)


# ----------------- weight-resident dense (+bias, +GELU) kernel -------------- #

def _dense_kernel(x_ref, w_ref, b_ref, o_ref, *, activation):
    y = jnp.dot(x_ref[...], w_ref[...], preferred_element_type=jnp.float32)
    y = y + b_ref[...].astype(jnp.float32)
    if activation == "gelu":  # exact (erf) GELU, as used by BERT
        y = 0.5 * y * (1.0 + jax.lax.erf(y * (1.0 / math.sqrt(2.0))))
    o_ref[...] = y.astype(o_ref.dtype)


def dense(x, w, b, activation=None, out_dtype=None):
    """y = act(x @ w + b). Weight-resident: full (K, N) weight block, grid over M."""
    M, K = x.shape
    _, N = w.shape
    tm = _pick_row_tile(M, _TM_DENSE)
    out_dtype = out_dtype or x.dtype
    # TODO(synk): K-tiled accumulator fallback for weights that exceed VMEM.
    return pl.pallas_call(
        functools.partial(_dense_kernel, activation=activation),
        out_shape=jax.ShapeDtypeStruct((M, N), out_dtype),
        grid_spec=pltpu.PrefetchScalarGridSpec(
            num_scalar_prefetch=0,
            grid=(M // tm,),
            in_specs=[
                pl.BlockSpec((tm, K), lambda i: (i, 0)),
                pl.BlockSpec((K, N), lambda i: (0, 0)),   # resident weight
                pl.BlockSpec((1, N), lambda i: (0, 0)),
            ],
            out_specs=pl.BlockSpec((tm, N), lambda i: (i, 0)),
        ),
        compiler_params=_mosaic_params("parallel"),
    )(x, w, b)


# ------------ weight-resident dense + residual-add + LayerNorm -------------- #

def _dense_add_ln_kernel(x_ref, w_ref, b_ref, r_ref, g_ref, be_ref, o_ref, *, eps):
    y = jnp.dot(x_ref[...], w_ref[...], preferred_element_type=jnp.float32)
    y = (y + b_ref[...].astype(jnp.float32) + r_ref[...].astype(jnp.float32))
    mean = jnp.mean(y, axis=-1, keepdims=True)
    yc = y - mean
    var = jnp.mean(yc * yc, axis=-1, keepdims=True)
    y = yc * jax.lax.rsqrt(var + eps)
    o_ref[...] = (y * g_ref[...].astype(jnp.float32)
                  + be_ref[...].astype(jnp.float32)).astype(o_ref.dtype)


def dense_add_ln(x, w, b, residual, gamma, beta, eps=1e-12, out_dtype=None):
    """LayerNorm((x @ w + b) + residual); LN fused as the matmul epilogue."""
    M, K = x.shape
    _, N = w.shape
    tm = _pick_row_tile(M, _TM_DENSE)
    out_dtype = out_dtype or x.dtype
    return pl.pallas_call(
        functools.partial(_dense_add_ln_kernel, eps=eps),
        out_shape=jax.ShapeDtypeStruct((M, N), out_dtype),
        grid_spec=pltpu.PrefetchScalarGridSpec(
            num_scalar_prefetch=0,
            grid=(M // tm,),
            in_specs=[
                pl.BlockSpec((tm, K), lambda i: (i, 0)),
                pl.BlockSpec((K, N), lambda i: (0, 0)),   # resident weight
                pl.BlockSpec((1, N), lambda i: (0, 0)),
                pl.BlockSpec((tm, N), lambda i: (i, 0)),  # residual
                pl.BlockSpec((1, N), lambda i: (0, 0)),
                pl.BlockSpec((1, N), lambda i: (0, 0)),
            ],
            out_specs=pl.BlockSpec((tm, N), lambda i: (i, 0)),
        ),
        compiler_params=_mosaic_params("parallel"),
    )(x, w, b, residual, gamma, beta)


# ----------------------- LayerNorm (no residual) kernel ---------------------- #

def _ln_kernel(x_ref, g_ref, b_ref, o_ref, *, eps):
    x = x_ref[...].astype(jnp.float32)
    mean = jnp.mean(x, axis=-1, keepdims=True)
    xc = x - mean
    var = jnp.mean(xc * xc, axis=-1, keepdims=True)
    y = xc * jax.lax.rsqrt(var + eps)
    o_ref[...] = (y * g_ref[...].astype(jnp.float32)
                  + b_ref[...].astype(jnp.float32)).astype(o_ref.dtype)


def layernorm(x, gamma, beta, eps=1e-12, out_dtype=None):
    M, H = x.shape
    tm = _pick_row_tile(M, _TM_DENSE)
    out_dtype = out_dtype or x.dtype
    return pl.pallas_call(
        functools.partial(_ln_kernel, eps=eps),
        out_shape=jax.ShapeDtypeStruct((M, H), out_dtype),
        grid_spec=pltpu.PrefetchScalarGridSpec(
            num_scalar_prefetch=0,
            grid=(M // tm,),
            in_specs=[
                pl.BlockSpec((tm, H), lambda i: (i, 0)),
                pl.BlockSpec((1, H), lambda i: (0, 0)),
                pl.BlockSpec((1, H), lambda i: (0, 0)),
            ],
            out_specs=pl.BlockSpec((tm, H), lambda i: (i, 0)),
        ),
        compiler_params=_mosaic_params("parallel"),
    )(x, gamma, beta)


# -------------- attention on packed QKV (no HBM transposes) ----------------- #
#
# Reads Q/K/V directly out of the packed [B, S, 3H] QKV activation via
# column-block BlockSpecs (block width H, column block index 0/1/2) and writes
# the context back as a lane-dense [B, S, H] slab.  Per-head softmax is done
# inside the kernel (heads live in 64-wide lane slices of the H columns); the
# per-head results are concatenated so the final store is a single lane-dense
# (tq, H) write.  The 1/sqrt(dh) scale is pre-folded into the Q weights.
# BERT sequences (S <= 512) fit one KV block, so a plain softmax is used.
# TODO(synk): KV-tiled online-softmax path for sequences longer than ~1k.

def _attention_kernel(q_ref, k_ref, v_ref, bias_ref, o_ref, *, num_heads):
    H = q_ref.shape[-1]
    dh = H // num_heads
    q = q_ref[0]              # (tq, H) bf16  (pre-scaled by 1/sqrt(dh))
    k = k_ref[0]              # (S,  H) bf16
    v = v_ref[0]              # (S,  H) bf16
    bias = bias_ref[0]        # (1,  S) f32 additive mask

    ctx_heads = []
    for h in range(num_heads):
        sl = slice(h * dh, (h + 1) * dh)
        qh, kh, vh = q[:, sl], k[:, sl], v[:, sl]
        # scores: contract the dh dims of q and k ("nt" matmul, no transpose copy)
        s = jax.lax.dot_general(qh, kh, (((1,), (1,)), ((), ())),
                                preferred_element_type=jnp.float32)   # (tq, S)
        s = s + bias
        m = jnp.max(s, axis=-1, keepdims=True)
        p = jnp.exp(s - m)
        l = jnp.sum(p, axis=-1, keepdims=True)
        ctx_h = jnp.dot(p.astype(vh.dtype), vh,
                        preferred_element_type=jnp.float32)           # (tq, dh)
        ctx_heads.append(ctx_h * pl.reciprocal(l, approx=False))
    ctx = jnp.concatenate(ctx_heads, axis=-1)                         # (tq, H)
    o_ref[0] = ctx.astype(o_ref.dtype)


def attention(qkv, mask_bias, *, num_heads, seq_len, hidden):
    """qkv: [B*S, 3H] packed Q|K|V (bf16); mask_bias: [B, 1, S] additive f32."""
    BS, threeH = qkv.shape
    H, S = hidden, seq_len
    B = BS // S
    assert threeH == 3 * H
    # Column-block addressing of the packed buffer needs H to be lane-aligned.
    assert H % 128 == 0, "packed-QKV attention requires hidden % 128 == 0"
    qkv3 = qkv.reshape(B, S, 3 * H)       # free reshape (no data movement)
    tq = _pick_row_tile(S, _TQ_ATTN)
    return pl.pallas_call(
        functools.partial(_attention_kernel, num_heads=num_heads),
        out_shape=jax.ShapeDtypeStruct((B, S, H), qkv.dtype),
        grid_spec=pltpu.PrefetchScalarGridSpec(
            num_scalar_prefetch=0,
            grid=(B, S // tq),
            in_specs=[
                pl.BlockSpec((1, tq, H), lambda b, qi: (b, qi, 0)),  # Q columns
                pl.BlockSpec((1, S, H), lambda b, qi: (b, 0, 1)),    # K columns
                pl.BlockSpec((1, S, H), lambda b, qi: (b, 0, 2)),    # V columns
                pl.BlockSpec((1, 1, S), lambda b, qi: (b, 0, 0)),    # mask bias
            ],
            out_specs=pl.BlockSpec((1, tq, H), lambda b, qi: (b, qi, 0)),
        ),
        compiler_params=_mosaic_params("parallel", "parallel"),
    )(qkv3, qkv3, qkv3, mask_bias)


# ------------------------------ Parameters --------------------------------- #

def init_params(key, cfg):
    H, I, V, P, L, O = (cfg["hidden"], cfg["intermediate"], cfg["vocab"],
                        cfg["max_pos"], cfg["layers"], cfg["outputs"])
    nH = cfg["heads"]
    dh = H // nH
    q_scale = 1.0 / math.sqrt(dh)

    keys = iter(jax.random.split(key, 8 + 8 * L))

    def nrm(shape):
        return 0.02 * jax.random.normal(next(keys), shape, dtype=jnp.float32)

    params = {
        "word_emb": nrm((V, H)).astype(jnp.bfloat16),
        "pos_emb": nrm((P, H)).astype(jnp.bfloat16),
        "type_emb": nrm((2, H)).astype(jnp.bfloat16),
        "emb_ln_g": jnp.ones((1, H), jnp.float32),
        "emb_ln_b": jnp.zeros((1, H), jnp.float32),
        "cls_w": nrm((H, O)).astype(jnp.bfloat16),
        "cls_b": jnp.zeros((1, O), jnp.float32),
        "layers": [],
    }
    for _ in range(L):
        # fused Q|K|V projection; fold 1/sqrt(dh) into the Q columns so the
        # attention kernel skips the per-score scale multiply.  (qkv_b is zero
        # here; a loaded checkpoint would scale its Q bias the same way.)
        qkv_w = nrm((H, 3 * H))
        qkv_w = qkv_w.at[:, :H].multiply(q_scale)
        params["layers"].append({
            "qkv_w": qkv_w.astype(jnp.bfloat16),
            "qkv_b": jnp.zeros((1, 3 * H), jnp.float32),
            "o_w": nrm((H, H)).astype(jnp.bfloat16),
            "o_b": jnp.zeros((1, H), jnp.float32),
            "ln1_g": jnp.ones((1, H), jnp.float32),
            "ln1_b": jnp.zeros((1, H), jnp.float32),
            "i_w": nrm((H, I)).astype(jnp.bfloat16),
            "i_b": jnp.zeros((1, I), jnp.float32),
            "f_w": nrm((I, H)).astype(jnp.bfloat16),
            "f_b": jnp.zeros((1, H), jnp.float32),
            "ln2_g": jnp.ones((1, H), jnp.float32),
            "ln2_b": jnp.zeros((1, H), jnp.float32),
        })
    return params


# ------------------------------- Forward ------------------------------------ #

def bert_model_forward(params, input_ids, attention_mask, cfg):
    B, S = input_ids.shape
    H, nH = cfg["hidden"], cfg["heads"]

    # Embedding gather + sum (JAX glue); token_type_ids = 0 as in the reference usage.
    emb = (params["word_emb"][input_ids].astype(jnp.float32)
           + params["pos_emb"][:S][None, :, :].astype(jnp.float32)
           + params["type_emb"][0][None, None, :].astype(jnp.float32))
    x2 = layernorm(emb.reshape(B * S, H), params["emb_ln_g"], params["emb_ln_b"],
                   out_dtype=jnp.bfloat16)

    # Extended attention mask -> additive bias [B, 1, S] (f32), broadcast over
    # heads and query positions inside the attention kernel.
    mask_bias = ((1.0 - attention_mask.astype(jnp.float32)) * (-1e9)
                 ).reshape(B, 1, S)

    for layer in params["layers"]:
        # fused QKV projection (weight-resident matmul) -> packed [B*S, 3H]
        qkv = dense(x2, layer["qkv_w"], layer["qkv_b"])
        # attention reads the packed buffer directly (no transpose / repack)
        ctx = attention(qkv, mask_bias, num_heads=nH, seq_len=S, hidden=H)
        ctx = ctx.reshape(B * S, H)                      # free reshape
        # output projection + residual + LayerNorm fused into one kernel
        x2 = dense_add_ln(ctx, layer["o_w"], layer["o_b"], x2,
                          layer["ln1_g"], layer["ln1_b"])
        # FFN up-projection with fused bias+GELU epilogue
        ffn = dense(x2, layer["i_w"], layer["i_b"], activation="gelu")
        # FFN down-projection + residual + LayerNorm fused into one kernel
        x2 = dense_add_ln(ffn, layer["f_w"], layer["f_b"], x2,
                          layer["ln2_g"], layer["ln2_b"])

    last_hidden = x2.reshape(B, S, H)
    cls = last_hidden[:, 0, :].astype(jnp.float32)       # outputs[:, 0, :]
    # nn.Dropout(0.2) is identity at inference time (eval mode).
    # Classifier ([B, H] x [H, num_labels]) is tiny; pallas_call overhead and a
    # 3-lane output would dominate, so use plain jnp.dot per the perf review.
    logits = jnp.dot(cls, params["cls_w"].astype(jnp.float32)) + params["cls_b"]
    return logits


# -------------------------------- Main --------------------------------------- #

if __name__ == "__main__":
    cfg = dict(vocab=64, hidden=128, heads=2, intermediate=256,
               layers=2, max_pos=32, outputs=3)
    B, S = 2, 16

    key = jax.random.PRNGKey(0)
    k_params, k_ids = jax.random.split(key)
    params = init_params(k_params, cfg)

    input_ids = jax.random.randint(k_ids, (B, S), 0, cfg["vocab"], dtype=jnp.int32)
    attention_mask = jnp.ones((B, S), dtype=jnp.int32).at[1, 12:].set(0)  # pad tail of row 1

    logits = bert_model_forward(params, input_ids, attention_mask, cfg)
    jax.block_until_ready(logits)
    assert logits.shape == (B, cfg["outputs"])
    assert bool(jnp.all(jnp.isfinite(logits.astype(jnp.float32))))
    print("KERNEL_OK")
</pallas_src>

<mosaic_0001>
module attributes {stable_mosaic.version = 11 : i64} {
  func.func @_ln_kernel(%arg0: i32, %arg1: memref<32x128xf32, #tpu.memory_space<vmem>>, %arg2: memref<1x128xf32, #tpu.memory_space<vmem>>, %arg3: memref<1x128xf32, #tpu.memory_space<vmem>>, %arg4: memref<32x128xbf16, #tpu.memory_space<vmem>>) attributes {dimension_semantics = [#tpu.dimension_semantics<parallel>], iteration_bounds = array<i64: 1>, scalar_prefetch = 0 : i64, scratch_operands = 0 : i64, tpu.core_type = #tpu.core_type<tc>, window_params = [{transform_indices = @transform_0, window_bounds = array<i64: 32, 128>}, {pipeline_mode = #tpu.pipeline_mode<synchronous>, transform_indices = @transform_1, window_bounds = array<i64: 1, 128>}, {pipeline_mode = #tpu.pipeline_mode<synchronous>, transform_indices = @transform_2, window_bounds = array<i64: 1, 128>}, {transform_indices = @transform_3, window_bounds = array<i64: 32, 128>}]} {
    %c0 = arith.constant 0 : index
    %c0_0 = arith.constant 0 : index
    %0 = vector.load %arg1[%c0, %c0_0] : memref<32x128xf32, #tpu.memory_space<vmem>>, vector<32x128xf32>
    %cst = arith.constant dense<0.000000e+00> : vector<32xf32>
    %1 = vector.multi_reduction <add>, %0, %cst [1] : vector<32x128xf32> to vector<32xf32>
    %2 = vector.shape_cast %1 : vector<32xf32> to vector<32x1xf32>
    %cst_1 = arith.constant 1.280000e+02 : f32
    %3 = vector.broadcast %cst_1 : f32 to vector<32x1xf32>
    %4 = arith.divf %2, %3 : vector<32x1xf32>
    %5 = vector.broadcast %4 : vector<32x1xf32> to vector<32x128xf32>
    %6 = arith.subf %0, %5 : vector<32x128xf32>
    %7 = arith.mulf %6, %6 : vector<32x128xf32>
    %cst_2 = arith.constant dense<0.000000e+00> : vector<32xf32>
    %8 = vector.multi_reduction <add>, %7, %cst_2 [1] : vector<32x128xf32> to vector<32xf32>
    %9 = vector.shape_cast %8 : vector<32xf32> to vector<32x1xf32>
    %cst_3 = arith.constant 1.280000e+02 : f32
    %10 = vector.broadcast %cst_3 : f32 to vector<32x1xf32>
    %11 = arith.divf %9, %10 : vector<32x1xf32>
    %cst_4 = arith.constant 9.99999996E-13 : f32
    %12 = vector.broadcast %cst_4 : f32 to vector<32x1xf32>
    %13 = arith.addf %11, %12 : vector<32x1xf32>
    %14 = math.rsqrt %13 : vector<32x1xf32>
    %15 = vector.broadcast %14 : vector<32x1xf32> to vector<32x128xf32>
    %16 = arith.mulf %6, %15 : vector<32x128xf32>
    %c0_5 = arith.constant 0 : index
    %c0_6 = arith.constant 0 : index
    %17 = vector.load %arg2[%c0_5, %c0_6] : memref<1x128xf32, #tpu.memory_space<vmem>>, vector<1x128xf32>
    %18 = vector.broadcast %17 : vector<1x128xf32> to vector<32x128xf32>
    %19 = arith.mulf %16, %18 : vector<32x128xf32>
    %c0_7 = arith.constant 0 : index
    %c0_8 = arith.constant 0 : index
    %20 = vector.load %arg3[%c0_7, %c0_8] : memref<1x128xf32, #tpu.memory_space<vmem>>, vector<1x128xf32>
    %21 = vector.broadcast %20 : vector<1x128xf32> to vector<32x128xf32>
    %22 = arith.addf %19, %21 : vector<32x128xf32>
    %23 = arith.truncf %22 : vector<32x128xf32> to vector<32x128xbf16>
    %c0_9 = arith.constant 0 : index
    %c0_10 = arith.constant 0 : index
    %24 = vector.load %arg4[%c0_9, %c0_10] : memref<32x128xbf16, #tpu.memory_space<vmem>>, vector<32x128xbf16>
    tpu.vector_store %arg4[%c0_9, %c0_10], %23 {strides = array<i32>} : memref<32x128xbf16, #tpu.memory_space<vmem>>, vector<32x128xbf16>,
    return
  }
  func.func @transform_0(%arg0: i32) -> (i32, i32) {
    %c0_i32 = arith.constant 0 : i32
    %c0_i32_0 = arith.constant 0 : i32
    return %arg0, %c0_i32 : i32, i32
  }
  func.func @transform_1(%arg0: i32) -> (i32, i32) {
    %c0_i32 = arith.constant 0 : i32
    %c0_i32_0 = arith.constant 0 : i32
    %c0_i32_1 = arith.constant 0 : i32
    return %c0_i32, %c0_i32_0 : i32, i32
  }
  func.func @transform_2(%arg0: i32) -> (i32, i32) {
    %c0_i32 = arith.constant 0 : i32
    %c0_i32_0 = arith.constant 0 : i32
    %c0_i32_1 = arith.constant 0 : i32
    return %c0_i32, %c0_i32_0 : i32, i32
  }
  func.func @transform_3(%arg0: i32) -> (i32, i32) {
    %c0_i32 = arith.constant 0 : i32
    %c0_i32_0 = arith.constant 0 : i32
    return %arg0, %c0_i32 : i32, i32
  }
}

</mosaic_0001>

<bundles_post_ra>
// kernel: tpu_custom_call.1
= control target key start
LH: loop header
LB: loop body
LE: loop exit
PB: predicated region body
PF: predicated region fallthrough
CT: control target
= control target key end

     0   :  { %8 = vsyncpa [#allocation3], 0  ;;  %s276_s0 = inlined_call_operand.hbm [shape: f32[32,128], index: 0, kind: input, shape index: {}]   ;;  %s277_s1 = inlined_call_operand.vmem [shape: f32[1,128], index: 1, kind: input, shape index: {}]   ;;  %s278_s2 = inlined_call_operand.vmem [shape: f32[1,128], index: 2, kind: input, shape index: {}]   ;;  %s279_s3 = inlined_call_operand.hbm [shape: bf16[32,128], index: 3, kind: output, shape index: {}]  }
   0x1   :  { %9 = vsyncpa [#allocation4], 0  ;;  %s220_s12 = smov [#allocation2]   ;;  %s172_s16 = scalar_lea.hbm %s276_s0, 512 }
   0x2   :  { %s15_s13 = sshll.u32 %s220_s12, 4  ;;  %p173_p0 = scmp.ne.s32.totalorder %s276_s0, %s172_s16  ;;  %s16_s13 = int_to_ptr.vmem [resolvable:$true] %s15_s13 }
   0x3   :  { %p176_p1 = scmp.lt.u32.totalorder %s172_s16, %s276_s0 }
   0x5   :  { %p178_p2 = pnand %p176_p1, %p173_p0 }
   0x7   :  { %181 = shalt.err (!%p178_p2)
}
   0x8   :  { %s182_s21 = scalar_lea.vmem %s16_s13, 512  ;;  %p187_p4 = scmp.lt.s32.totalorder %s16_s13, %s16_s13 }
   0x9   :  { %p183_p3 = scmp.ne.s32.totalorder %s16_s13, %s182_s21  ;;  %p188_p5 = scmp.lt.s32.totalorder %s182_s21, %s182_s21 }
   0xb   :  { %p189_p6 = por %p188_p5, %p187_p4 }
   0xd   :  { %p190_p7 = pnand %p189_p6, %p183_p3 }
   0xf   :  { %193 = shalt.err (!%p190_p7)
}
  0x10   :  { %s221_s22 = smov 128   ;;  %s222_s23 = smov 8  }
  0x11   :  { %21 = dma.hbm_to_vmem [thread:$0]  %s276_s0, 512, %s16_s13, [#allocation3], %s221_s22, %s221_s22, %s222_s23  }
  0x12   :  { %216 = dma.done.wait [#allocation3], 512  }
  0x13   :  { %217 = vsyncadd [#allocation3], 4294966784  ;;  %v29_v0 = vld [vmem:[#allocation2] sm:$0xff]  ;;  %v31_v1 = vld [vmem:[#allocation2 + $0x10] sm:$0xff]  ;;  %s223_s29 = smov [#allocation5]  }
  0x14   :  { %33 = vadd.xlane.f32.xlu0 %v29_v0  ;;  %37 = vadd.xlane.f32.xlu1 %v31_v1  ;;  %v30_v2 = vld [vmem:[#allocation2 + $0x8] sm:$0xff]  ;;  %v32_v3 = vld [vmem:[#allocation2 + $0x18] sm:$0xff]  ;;  %v137_v34 = vld [vmem:[%s277_s1] ss:$0 sm:$0xff]  ;;  %s125_s30 = sshll.u32 %s223_s29, 4  ;;  %s126_s30 = int_to_ptr.vmem [resolvable:$true] %s125_s30 }
  0x15   :  { %v138_v40 = vld [vmem:[%s278_s2] ss:$0 sm:$0xff]  ;;  %s194_s1 = scalar_lea.vmem %s126_s30, 256  ;;  %p199_p9 = scmp.lt.s32.totalorder %s126_s30, %s126_s30 }
  0x16   :  { %p195_p8 = scmp.ne.s32.totalorder %s126_s30, %s194_s1  ;;  %p200_p10 = scmp.lt.s32.totalorder %s194_s1, %s194_s1 }
  0x18   :  { %35 = vadd.xlane.f32.xlu0 %v30_v2  ;;  %39 = vadd.xlane.f32.xlu1 %v32_v3  ;;  %p201_p11 = por %p200_p10, %p199_p9 }
  0x1a   :  { %p202_p12 = pnand %p201_p11, %p195_p8 }
  0xa1   :  { %v34_v4 = vpop.xlane.xlu0 %33  ;;  %v38_v5 = vpop.xlane.xlu1 %37 }
  0xa2   :  { %v42_v6 = vmul.f32 0.0078125, %v34_v4  ;;  %v44_v7 = vmul.f32 0.0078125, %v38_v5 }
  0xa4   :  { %v46_v8 = vsub.f32 %v29_v0, %v42_v6  ;;  %v48_v9 = vsub.f32 %v31_v1, %v44_v7 }
  0xa5   :  { %v36_v10 = vpop.xlane.xlu0 %35  ;;  %v40_v11 = vpop.xlane.xlu1 %39 }
  0xa6   :  { %v43_v12 = vmul.f32 0.0078125, %v36_v10  ;;  %v50_v13 = vmul.f32 %v46_v8, %v46_v8  ;;  %v45_v14 = vmul.f32 0.0078125, %v40_v11  ;;  %v52_v17 = vmul.f32 %v48_v9, %v48_v9 }
  0xa8   :  { %v47_v15 = vsub.f32 %v30_v2, %v43_v12  ;;  %54 = vadd.xlane.f32.xlu0 %v50_v13  ;;  %v49_v16 = vsub.f32 %v32_v3, %v45_v14 }
  0xaa   :  { %v51_v18 = vmul.f32 %v47_v15, %v47_v15  ;;  %v53_v19 = vmul.f32 %v49_v16, %v49_v16 }
  0xac   :  { %58 = vadd.xlane.f32.xlu0 %v52_v17  ;;  %56 = vadd.xlane.f32.xlu1 %v51_v18 }
  0xb0   :  { %60 = vadd.xlane.f32.xlu1 %v53_v19 }
 0x135   :  { %v55_v20 = vpop.xlane.xlu0 %54 }
 0x136   :  { %v62_v21 = vmul.f32 0.0078125, %v55_v20 }
 0x138   :  { %v66_v22 = vadd.f32 1e-12, %v62_v21 }
 0x139   :  { %v57_v23 = vpop.xlane.xlu1 %56  ;;  %v59_v24 = vpop.xlane.xlu0 %58 }
 0x13a   :  { %164 = vrsqrt.f32 %v66_v22  ;;  %v63_v25 = vmul.f32 0.0078125, %v57_v23  ;;  %v64_v26 = vmul.f32 0.0078125, %v59_v24 }
 0x13c   :  { %v67_v27 = vadd.f32 1e-12, %v63_v25  ;;  %v68_v28 = vadd.f32 1e-12, %v64_v26 }
 0x13d   :  { %v61_v29 = vpop.xlane.xlu1 %60 }
 0x13e   :  { %166 = vrsqrt.f32 %v67_v27  ;;  %v65_v30 = vmul.f32 0.0078125, %v61_v29 }
 0x13f   :  { %168 = vrsqrt.f32 %v68_v28 }
 0x140   :  { %v69_v31 = vadd.f32 1e-12, %v65_v30 }
 0x142   :  { %170 = vrsqrt.f32 %v69_v31 }
 0x144   :  { %v165_v32 = vpop.eup %164 }
 0x145   :  { %v74_v33 = vmul.f32 %v165_v32, %v46_v8 }
 0x147   :  { %v85_v38 = vmul.f32 %v137_v34, %v74_v33 }
 0x148   :  { %v167_v35 = vpop.eup %166 }
 0x149   :  { %v169_v36 = vpop.eup %168  ;;  %v75_v37 = vmul.f32 %v167_v35, %v47_v15  ;;  %v96_v45 = vadd.f32 %v138_v40, %v85_v38 }
 0x14a   :  { %v76_v39 = vmul.f32 %v169_v36, %v48_v9 }
 0x14b   :  { %v86_v41 = vmul.f32 %v137_v34, %v75_v37 }
 0x14c   :  { %v171_v42 = vpop.eup %170  ;;  %v87_v43 = vmul.f32 %v137_v34, %v76_v39 }
 0x14d   :  { %v77_v44 = vmul.f32 %v171_v42, %v49_v16  ;;  %v97_v46 = vadd.f32 %v138_v40, %v86_v41 }
 0x14e   :  { %v98_v49 = vadd.f32 %v138_v40, %v87_v43 }
 0x14f   :  { %v88_v47 = vmul.f32 %v137_v34, %v77_v44  ;;  %v150_v48 = vpack.c.bf16 %v97_v46, %v96_v45 }
 0x151   :  { %v99_v50 = vadd.f32 %v138_v40, %v88_v47  ;;  %151 = vst [vmem:[#allocation5] sm:$0xff] %v150_v48  }
 0x153   :  { %v155_v51 = vpack.c.bf16 %v99_v50, %v98_v49 }
 0x155   :  { %157 = vst [vmem:[#allocation5 + $0x8] sm:$0xff] %v155_v51  }
 0x156   :  { %205 = shalt.err (!%p202_p12)
}
 0x157   :  { %s206_s5 = scalar_lea.hbm %s279_s3, 256 }
 0x158   :  { %p207_p13 = scmp.ne.s32.totalorder %s279_s3, %s206_s5  ;;  %p210_p0 = scmp.lt.u32.totalorder %s206_s5, %s279_s3 }
 0x15a   :  { %p212_p1 = pnand %p210_p0, %p207_p13 }
 0x15c   :  { %215 = shalt.err (!%p212_p1)
}
 0x15d   :  { %s224_s10 = smov 64   ;;  %s225_s11 = smov 4  }
 0x15e   :  { %131 = dma.vmem_to_hbm [thread:$0]  %s126_s30, 256, %s279_s3, [#allocation4], %s224_s10, %s224_s10, %s225_s11  }
 0x15f   :  { %218 = dma.done.wait [#allocation4], 256  }
 0x160   :  { %219 = vsyncadd [#allocation4], 4294967040 }
 0x161   :  { %135 = vsyncpa [#allocation3], 1 }
 0x162   :  { %136 = vsyncpa [#allocation4], 1 }

</bundles_post_ra>
